<compile_context>
chip_gen: v7x
topology: tpu7x:2x2x1
jax: 0.10.0
libtpu: 0.0.40
codegen_flags: <defaults>
</compile_context>

<pallas_src>
import functools

import jax
import jax.numpy as jnp
from jax import lax
from jax.experimental import pallas as pl
from jax.experimental.pallas import tpu as pltpu


# ---------------------------------------------------------------------------
# Helpers: tiling, VMEM budget, generation detection
# ---------------------------------------------------------------------------
def _round_up(x, q):
    return ((x + q - 1) // q) * q


def _tile(dim, target, quantum):
    """Largest divisor of `dim` that is <= `target` and a multiple of
    `quantum`; falls back to the full extent (always a legal block shape)."""
    if dim <= target:
        return dim
    t = (target // quantum) * quantum
    while t >= quantum:
        if dim % t == 0:
            return t
        t -= quantum
    return dim


def _vmem_limit_bytes():
    """~75% of physical VMEM: ~96 MiB on v5e/v6e (128 MiB), ~48 MiB on v7x."""
    try:
        cap = int(pltpu.get_tpu_info().vmem_capacity_bytes)
    except Exception:
        cap = 64 * 1024 * 1024
    return int(cap * 3 // 4)


def _has_bf16_eup():
    """bf16 exp path is profitable on v6e/v7x; keep f32 exp on v5 and older."""
    try:
        kind = jax.devices()[0].device_kind.lower()
    except Exception:
        return True
    return not any(tag in kind for tag in ("v2", "v3", "v4", "v5"))


# ---------------------------------------------------------------------------
# Tiled linear:  y = x @ W + b
# ---------------------------------------------------------------------------
def _linear_acc_kernel(x_ref, w_ref, b_ref, o_ref, acc_ref):
    """Non-f32 output: accumulate in an f32 VMEM scratch, cast at the end."""
    k = pl.program_id(2)

    @pl.when(k == 0)
    def _():
        acc_ref[...] = jnp.zeros_like(acc_ref)

    acc_ref[...] += jnp.dot(
        x_ref[...], w_ref[...], preferred_element_type=jnp.float32
    )

    @pl.when(k == pl.num_programs(2) - 1)
    def _():
        o_ref[...] = (acc_ref[...] + b_ref[...]).astype(o_ref.dtype)


def _linear_out_kernel(x_ref, w_ref, b_ref, o_ref):
    """f32 output: accumulate straight into the resident output block (its
    block index is constant across k) -- no scratch, no finalize copy."""
    k = pl.program_id(2)

    @pl.when(k == 0)
    def _():
        o_ref[...] = jnp.zeros(o_ref.shape, o_ref.dtype) + b_ref[...]

    o_ref[...] += jnp.dot(
        x_ref[...], w_ref[...], preferred_element_type=jnp.float32
    )


def _pallas_linear(x2d, w_in_out, b, out_dtype, vmem_limit):
    """x2d: (M, K), w_in_out: (K, N_out), b: (N_out,) f32 -> (M, N_out)."""
    M, K = x2d.shape
    Kw, N_out = w_in_out.shape
    assert K == Kw
    sub = 16 if jnp.dtype(x2d.dtype).itemsize == 2 else 8

    # Pad the row axis to the sublane quantum (padded rows sliced off below).
    M_pad = _round_up(M, sub)
    if M_pad != M:
        x2d = jnp.pad(x2d, ((0, M_pad - M), (0, 0)))

    tm = _tile(M_pad, 512, sub)
    tn = _tile(N_out, 256, 128)
    # Contraction axis: multiples of 128, else full extent (always legal).
    tk = _tile(K, 512, 128)
    grid = (M_pad // tm, N_out // tn, K // tk)

    if out_dtype == jnp.float32:
        kernel, scratch = _linear_out_kernel, []
    else:
        kernel, scratch = _linear_acc_kernel, [pltpu.VMEM((tm, tn), jnp.float32)]

    out = pl.pallas_call(
        kernel,
        out_shape=jax.ShapeDtypeStruct((M_pad, N_out), out_dtype),
        grid_spec=pltpu.PrefetchScalarGridSpec(
            num_scalar_prefetch=0,
            grid=grid,
            in_specs=[
                pl.BlockSpec((tm, tk), lambda i, j, k: (i, k)),
                pl.BlockSpec((tk, tn), lambda i, j, k: (k, j)),
                pl.BlockSpec((1, tn), lambda i, j, k: (0, j)),
            ],
            out_specs=pl.BlockSpec((tm, tn), lambda i, j, k: (i, j)),
            scratch_shapes=scratch,
        ),
        compiler_params=pltpu.CompilerParams(
            dimension_semantics=("parallel", "parallel", "arbitrary"),
            vmem_limit_bytes=vmem_limit,
        ),
    )(x2d, w_in_out, b.reshape(1, N_out))
    return out[:M] if M_pad != M else out


# ---------------------------------------------------------------------------
# Flash-style multi-head attention (heads split/combined inside the kernel)
# ---------------------------------------------------------------------------
def _mha_attn_kernel(q_ref, k_ref, v_ref, o_ref, m_sc, l_sc, acc_sc, *,
                     num_heads, kv_len, mask_kv, use_bf16_exp):
    # q_ref: (1, tS, E); k_ref/v_ref: (1, tT, E); o_ref: (1, tS, E)
    # m_sc/l_sc: (H, tS, 1) f32 running max / sum; acc_sc: (H, tS, D) f32.
    kv = pl.program_id(2)

    @pl.when(kv == 0)
    def _():
        m_sc[...] = jnp.full(m_sc.shape, -jnp.inf, dtype=jnp.float32)
        l_sc[...] = jnp.zeros(l_sc.shape, dtype=jnp.float32)
        acc_sc[...] = jnp.zeros(acc_sc.shape, dtype=jnp.float32)

    tS = q_ref.shape[1]
    tT = k_ref.shape[1]
    E = q_ref.shape[-1]
    D = E // num_heads

    # 1/sqrt(D) is already folded into Wq -- no per-KV-step rescale of Q here.
    q_all = q_ref[0]          # (tS, E)
    k_all = k_ref[0]          # (tT, E)
    v_all = v_ref[0]          # (tT, E)

    if mask_kv:
        # Drop padded KV rows (beyond the true sequence length) after the exp.
        # Same mask for all heads; statically absent when T is a tile multiple.
        col = lax.broadcasted_iota(jnp.int32, (tS, tT), 1) + kv * tT
        valid = col < kv_len

    # NOTE: static unroll over heads -- fine for small H; for H >= 8 with
    # D % 128 == 0, move heads onto a grid axis to bound vreg pressure.
    for h in range(num_heads):
        lo, hi = h * D, (h + 1) * D
        q_h = q_all[:, lo:hi]     # (tS, D)
        k_h = k_all[:, lo:hi]     # (tT, D)
        v_h = v_all[:, lo:hi]     # (tT, D)

        # Scores: contract head_dim directly, no explicit k_h.T materialized.
        s = lax.dot_general(
            q_h, k_h, (((1,), (1,)), ((), ())),
            preferred_element_type=jnp.float32,
        )                         # (tS, tT) f32

        m_prev = m_sc[h]          # (tS, 1)
        m_new = jnp.maximum(m_prev, jnp.max(s, axis=-1, keepdims=True))
        alpha = jnp.exp(m_prev - m_new)

        if use_bf16_exp:
            # bf16 EUP exp (v6e/v7x); feeds the PV MXU matmul directly.
            p = jnp.exp((s - m_new).astype(jnp.bfloat16))   # (tS, tT) bf16
        else:
            p = jnp.exp(s - m_new)                          # (tS, tT) f32
        if mask_kv:
            p = jnp.where(valid, p, jnp.zeros_like(p))

        l_sc[h] = alpha * l_sc[h] + jnp.sum(
            p.astype(jnp.float32), axis=-1, keepdims=True)
        pv = jnp.dot(p if use_bf16_exp else p.astype(v_h.dtype), v_h,
                     preferred_element_type=jnp.float32)
        acc_sc[h] = alpha * acc_sc[h] + pv
        m_sc[h] = m_new

    @pl.when(kv == pl.num_programs(2) - 1)
    def _():
        # Normalize each head and emit one lane-dense (tS, E) store with the
        # heads already concatenated along the lane axis (no combine transpose).
        outs = [
            (acc_sc[h] * pl.reciprocal(l_sc[h], approx=True)).astype(o_ref.dtype)
            for h in range(num_heads)
        ]
        o_ref[0] = jnp.concatenate(outs, axis=-1)


def _pallas_attention(q, k, v, num_heads, use_bf16_exp, vmem_limit):
    """q: (N, S, E), k/v: (N, T, E) -> (N, S, E) attention output with the
    heads concatenated along the last (lane) axis."""
    N, S, E = q.shape
    T = k.shape[1]
    D = E // num_heads
    db = jnp.dtype(q.dtype).itemsize
    sub = 16 if db == 2 else 8

    # Pad seq axes to the sublane quantum (KV tail masked in-kernel, query
    # tail sliced off) so _tile never falls back to a huge full-extent tile.
    S_pad = _round_up(S, sub)
    T_pad = _round_up(T, sub)
    if S_pad != S:
        q = jnp.pad(q, ((0, 0), (0, S_pad - S), (0, 0)))
    if T_pad != T:
        k = jnp.pad(k, ((0, 0), (0, T_pad - T), (0, 0)))
        v = jnp.pad(v, ((0, 0), (0, T_pad - T), (0, 0)))

    # Large tiles (amortize per-grid-step overhead, fill the MXU for small D),
    # trimmed to the per-generation VMEM budget below.
    tS = _tile(S_pad, 512, sub)
    tT = _tile(T_pad, 1024, sub)

    # Keep >= 2 parallel grid points so the second TensorCore (v7x megacore)
    # has work even at tiny batch sizes.
    if N * (S_pad // tS) < 2:
        cand = _tile(S_pad, max(sub, tS // 2), sub)
        if N * (S_pad // cand) >= 2:
            tS = cand

    def footprint(ts, tt):
        blocks = 2 * (2 * ts * E + 2 * tt * E) * db     # double-buffered q/o + k/v
        scratch = 4 * ts * (2 * num_heads + E)          # f32 m/l/acc scratch
        work = 8 * ts * tt                              # s/p working tiles
        return blocks + scratch + work

    budget = vmem_limit // 2
    while footprint(tS, tT) > budget:
        if tT > sub:
            nt = _tile(T_pad, max(sub, tT // 2), sub)
            if nt < tT:
                tT = nt
                continue
        if tS > sub:
            ns = _tile(S_pad, max(sub, tS // 2), sub)
            if ns < tS:
                tS = ns
                continue
        break

    grid = (N, S_pad // tS, T_pad // tT)
    kernel = functools.partial(
        _mha_attn_kernel, num_heads=num_heads, kv_len=T,
        mask_kv=(T_pad != T), use_bf16_exp=use_bf16_exp)

    out = pl.pallas_call(
        kernel,
        out_shape=jax.ShapeDtypeStruct((N, S_pad, E), q.dtype),
        grid_spec=pltpu.PrefetchScalarGridSpec(
            num_scalar_prefetch=0,
            grid=grid,
            in_specs=[
                pl.BlockSpec((1, tS, E), lambda n, si, ti: (n, si, 0)),
                pl.BlockSpec((1, tT, E), lambda n, si, ti: (n, ti, 0)),
                pl.BlockSpec((1, tT, E), lambda n, si, ti: (n, ti, 0)),
            ],
            out_specs=pl.BlockSpec((1, tS, E), lambda n, si, ti: (n, si, 0)),
            scratch_shapes=[
                pltpu.VMEM((num_heads, tS, 1), jnp.float32),   # running max
                pltpu.VMEM((num_heads, tS, 1), jnp.float32),   # running sum
                pltpu.VMEM((num_heads, tS, D), jnp.float32),   # accumulator
            ],
        ),
        compiler_params=pltpu.CompilerParams(
            dimension_semantics=("parallel", "parallel", "arbitrary"),
            vmem_limit_bytes=vmem_limit,
        ),
    )(q, k, v)
    return out[:, :S, :] if S_pad != S else out


# ---------------------------------------------------------------------------
# Module wrapper (parameter setup + glue)
# ---------------------------------------------------------------------------
class MultiHeadAttention:
    def __init__(self, embed_dim, num_heads, dropout=0.1, *, key,
                 compute_dtype=jnp.bfloat16):
        assert embed_dim % num_heads == 0
        self.embed_dim = embed_dim
        self.n_head = num_heads
        self.head_dim = embed_dim // num_heads
        self.dropout = dropout  # eval-mode no-op
        self.compute_dtype = compute_dtype
        self.use_bf16_exp = _has_bf16_eup() and compute_dtype == jnp.bfloat16
        self.vmem_limit = _vmem_limit_bytes()

        # Deterministic init mimicking nn.Linear default (uniform +/-1/sqrt(fan_in)).
        keys = jax.random.split(key, 8)
        bound = 1.0 / (embed_dim ** 0.5)

        def _w(kk):  # stored pre-transposed as (in, out) -- no per-call .T
            return jax.random.uniform(
                kk, (embed_dim, embed_dim), jnp.float32, -bound, bound)

        def _b(kk):
            return jax.random.uniform(kk, (embed_dim,), jnp.float32, -bound, bound)

        # Weights in the MXU-friendly compute dtype; the 1/sqrt(D) softmax
        # scale is folded into Wq / bq once (free) so the attention kernel
        # never rescales Q. Biases stay f32 (added to f32 accumulators).
        scale = 1.0 / (self.head_dim ** 0.5)
        self.Wq_w = (_w(keys[0]) * scale).astype(compute_dtype)
        self.Wq_b = _b(keys[1]) * scale
        self.Wk_w = _w(keys[2]).astype(compute_dtype)
        self.Wk_b = _b(keys[3])
        self.Wv_w = _w(keys[4]).astype(compute_dtype)
        self.Wv_b = _b(keys[5])
        self.Wo_w = _w(keys[6]).astype(compute_dtype)
        self.Wo_b = _b(keys[7])

    def __call__(self, q_data, k_data, v_data, attn_mask=None):
        # q_data: (N, S, E), k_data/v_data: (N, T, E)
        # TODO(synk): attn_mask is ignored (reference passes attn_mask=None).
        N, S, E = q_data.shape
        T = k_data.shape[1]
        H = self.n_head
        cd = self.compute_dtype
        vl = self.vmem_limit

        # Activations in bf16 (half the HBM/VMEM/DMA bytes, full-rate MXU);
        # every matmul still accumulates in f32.
        xq = q_data.astype(cd).reshape(N * S, E)
        xk = k_data.astype(cd).reshape(N * T, E)
        xv = v_data.astype(cd).reshape(N * T, E)

        # Q/K/V projections (tiled Pallas matmuls). Outputs stay (N, seq, E);
        # the head split happens inside the attention kernel -> no HBM
        # transposes between pallas_calls.
        # TODO(synk): fuse K/V (and Q for self-attention) into one pallas_call
        #             when the inputs alias, so activations are read once.
        q = _pallas_linear(xq, self.Wq_w, self.Wq_b, cd, vl).reshape(N, S, E)
        k = _pallas_linear(xk, self.Wk_w, self.Wk_b, cd, vl).reshape(N, T, E)
        v = _pallas_linear(xv, self.Wv_w, self.Wv_b, cd, vl).reshape(N, T, E)

        # Flash-style multi-head attention; output is already (N, S, E) with
        # heads concatenated along the lane axis (combine transpose is free).
        attn_out = _pallas_attention(q, k, v, H, self.use_bf16_exp, vl)

        # Output projection (multi_head_combine); f32 output accumulates
        # directly into the resident output block (no scratch).
        output = _pallas_linear(
            attn_out.reshape(N * S, E), self.Wo_w, self.Wo_b, jnp.float32, vl
        ).reshape(N, S, E)

        attention = None  # reference forward returns attention=None
        return output, attention


# ---------------------------------------------------------------------------
# Demo
# ---------------------------------------------------------------------------
if __name__ == "__main__":
    key = jax.random.PRNGKey(0)
    k_mod, k_q, k_k, k_v = jax.random.split(key, 4)

    N, S, T, E, H = 2, 8, 8, 32, 4  # batch=2, seq=8, embed=32, heads=4
    mha = MultiHeadAttention(embed_dim=E, num_heads=H, dropout=0.1, key=k_mod)

    q_data = jax.random.normal(k_q, (N, S, E), jnp.float32)
    k_data = jax.random.normal(k_k, (N, T, E), jnp.float32)
    v_data = jax.random.normal(k_v, (N, T, E), jnp.float32)

    out, attn = mha(q_data, k_data, v_data, attn_mask=None)
    out = jax.block_until_ready(out)

    assert out.shape == (N, S, E)
    assert out.dtype == jnp.float32
    assert attn is None
    assert bool(jnp.all(jnp.isfinite(out)))
    print("KERNEL_OK")
</pallas_src>

<mosaic_0001>
module attributes {stable_mosaic.version = 11 : i64} {
  func.func @_linear_acc_kernel(%arg0: i32, %arg1: i32, %arg2: i32, %arg3: memref<16x32xbf16, #tpu.memory_space<vmem>>, %arg4: memref<32x32xbf16, #tpu.memory_space<vmem>>, %arg5: memref<1x32xf32, #tpu.memory_space<vmem>>, %arg6: memref<16x32xbf16, #tpu.memory_space<vmem>>, %arg7: memref<16x32xf32, #tpu.memory_space<vmem>>) attributes {dimension_semantics = [#tpu.dimension_semantics<parallel>, #tpu.dimension_semantics<parallel>, #tpu.dimension_semantics<arbitrary>], iteration_bounds = array<i64: 1, 1, 1>, scalar_prefetch = 0 : i64, scratch_operands = 1 : i64, tpu.core_type = #tpu.core_type<tc>, window_params = [{transform_indices = @transform_0, window_bounds = array<i64: 16, 32>}, {transform_indices = @transform_1, window_bounds = array<i64: 32, 32>}, {transform_indices = @transform_2, window_bounds = array<i64: 1, 32>}, {transform_indices = @transform_3, window_bounds = array<i64: 16, 32>}]} {
    %c0_i32 = arith.constant 0 : i32
    %0 = arith.cmpi eq, %arg2, %c0_i32 : i32
    %1 = arith.extui %0 : i1 to i32
    %c0_i32_0 = arith.constant 0 : i32
    %2 = arith.cmpi ne, %1, %c0_i32_0 : i32
    scf.if %2 {
      %cst_10 = arith.constant 0.000000e+00 : f32
      %12 = vector.broadcast %cst_10 : f32 to vector<16x32xf32>
      %c0_11 = arith.constant 0 : index
      %c0_12 = arith.constant 0 : index
      %13 = vector.load %arg7[%c0_11, %c0_12] : memref<16x32xf32, #tpu.memory_space<vmem>>, vector<16x32xf32>
      tpu.vector_store %arg7[%c0_11, %c0_12], %12 {strides = array<i32>} : memref<16x32xf32, #tpu.memory_space<vmem>>, vector<16x32xf32>,
    } else {
    }
    %c0 = arith.constant 0 : index
    %c0_1 = arith.constant 0 : index
    %3 = vector.load %arg7[%c0, %c0_1] : memref<16x32xf32, #tpu.memory_space<vmem>>, vector<16x32xf32>
    %c0_2 = arith.constant 0 : index
    %c0_3 = arith.constant 0 : index
    %4 = vector.load %arg3[%c0_2, %c0_3] : memref<16x32xbf16, #tpu.memory_space<vmem>>, vector<16x32xbf16>
    %c0_4 = arith.constant 0 : index
    %c0_5 = arith.constant 0 : index
    %5 = vector.load %arg4[%c0_4, %c0_5] : memref<32x32xbf16, #tpu.memory_space<vmem>>, vector<32x32xbf16>
    %cst = arith.constant dense<0.000000e+00> : vector<16x32xf32>
    %6 = tpu.matmul %4, %5, %cst {dimension_numbers = #tpu.dot_dimension_numbers<[1], [0], [0], [1], [0, 0, 1, 1], [], []>} : vector<16x32xbf16>, vector<32x32xbf16>, vector<16x32xf32> -> vector<16x32xf32>
    %7 = arith.addf %3, %6 : vector<16x32xf32>
    %c0_6 = arith.constant 0 : index
    %c0_7 = arith.constant 0 : index
    %8 = vector.load %arg7[%c0_6, %c0_7] : memref<16x32xf32, #tpu.memory_space<vmem>>, vector<16x32xf32>
    tpu.vector_store %arg7[%c0_6, %c0_7], %7 {strides = array<i32>} : memref<16x32xf32, #tpu.memory_space<vmem>>, vector<16x32xf32>,
    %c0_i32_8 = arith.constant 0 : i32
    %9 = arith.cmpi eq, %arg2, %c0_i32_8 : i32
    %10 = arith.extui %9 : i1 to i32
    %c0_i32_9 = arith.constant 0 : i32
    %11 = arith.cmpi ne, %10, %c0_i32_9 : i32
    scf.if %11 {
      %c0_10 = arith.constant 0 : index
      %c0_11 = arith.constant 0 : index
      %12 = vector.load %arg7[%c0_10, %c0_11] : memref<16x32xf32, #tpu.memory_space<vmem>>, vector<16x32xf32>
      %c0_12 = arith.constant 0 : index
      %c0_13 = arith.constant 0 : index
      %13 = vector.load %arg5[%c0_12, %c0_13] : memref<1x32xf32, #tpu.memory_space<vmem>>, vector<1x32xf32>
      %14 = vector.broadcast %13 : vector<1x32xf32> to vector<16x32xf32>
      %15 = arith.addf %12, %14 : vector<16x32xf32>
      %16 = arith.truncf %15 : vector<16x32xf32> to vector<16x32xbf16>
      %c0_14 = arith.constant 0 : index
      %c0_15 = arith.constant 0 : index
      %17 = vector.load %arg6[%c0_14, %c0_15] : memref<16x32xbf16, #tpu.memory_space<vmem>>, vector<16x32xbf16>
      tpu.vector_store %arg6[%c0_14, %c0_15], %16 {strides = array<i32>} : memref<16x32xbf16, #tpu.memory_space<vmem>>, vector<16x32xbf16>,
    } else {
    }
    return
  }
  func.func @transform_0(%arg0: i32, %arg1: i32, %arg2: i32) -> (i32, i32) {
    %c0_i32 = arith.constant 0 : i32
    return %arg0, %arg2 : i32, i32
  }
  func.func @transform_1(%arg0: i32, %arg1: i32, %arg2: i32) -> (i32, i32) {
    %c0_i32 = arith.constant 0 : i32
    return %arg2, %arg1 : i32, i32
  }
  func.func @transform_2(%arg0: i32, %arg1: i32, %arg2: i32) -> (i32, i32) {
    %c0_i32 = arith.constant 0 : i32
    %c0_i32_0 = arith.constant 0 : i32
    return %c0_i32, %arg1 : i32, i32
  }
  func.func @transform_3(%arg0: i32, %arg1: i32, %arg2: i32) -> (i32, i32) {
    %c0_i32 = arith.constant 0 : i32
    return %arg0, %arg1 : i32, i32
  }
}

</mosaic_0001>

<bundles_post_ra>
// kernel: tpu_custom_call.1
= control target key start
LH: loop header
LB: loop body
LE: loop exit
PB: predicated region body
PF: predicated region fallthrough
CT: control target
= control target key end

     0   :  { %8 = vsyncpa [#allocation4], 0  ;;  %s350_s0 = inlined_call_operand.hbm [shape: bf16[16,32], index: 0, kind: input, shape index: {}]   ;;  %s351_s1 = inlined_call_operand.hbm [shape: bf16[32,32], index: 1, kind: input, shape index: {}]   ;;  %s352_s2 = inlined_call_operand.vmem [shape: f32[1,32], index: 2, kind: input, shape index: {}]   ;;  %s353_s3 = inlined_call_operand.hbm [shape: bf16[16,32], index: 3, kind: output, shape index: {}]  }
   0x1   :  { %9 = vsyncpa [#allocation7], 0 }
   0x2   :  { %10 = vsyncpa [#allocation5], 0  ;;  %s270_s12 = smov [#allocation3]   ;;  %s198_s16 = scalar_lea.hbm %s350_s0, 128 }
   0x3   :  { %s16_s13 = sshll.u32 %s270_s12, 4  ;;  %p199_p0 = scmp.ne.s32.totalorder %s350_s0, %s198_s16  ;;  %s17_s13 = int_to_ptr.vmem [resolvable:$true] %s16_s13 }
   0x4   :  { %p202_p1 = scmp.lt.u32.totalorder %s198_s16, %s350_s0 }
   0x6   :  { %p204_p2 = pnand %p202_p1, %p199_p0 }
   0x8   :  { %207 = shalt.err (!%p204_p2)
}
   0x9   :  { %s208_s21 = scalar_lea.vmem %s17_s13, 128  ;;  %p213_p4 = scmp.lt.s32.totalorder %s17_s13, %s17_s13 }
   0xa   :  { %p209_p3 = scmp.ne.s32.totalorder %s17_s13, %s208_s21  ;;  %p214_p5 = scmp.lt.s32.totalorder %s208_s21, %s208_s21 }
   0xc   :  { %p215_p6 = por %p214_p5, %p213_p4 }
   0xe   :  { %p216_p7 = pnand %p215_p6, %p209_p3 }
  0x10   :  { %219 = shalt.err (!%p216_p7)
}
  0x11   :  { %s271_s22 = smov 64   ;;  %s272_s23 = smov 4  }
  0x12   :  { %22 = dma.hbm_to_vmem [thread:$0]  %s350_s0, 128, %s17_s13, [#allocation4], %s271_s22, %s271_s22, %s272_s23  }
  0x13   :  { %s273_s26 = smov [#allocation6]   ;;  %s220_s30 = scalar_lea.hbm %s351_s1, 256 }
  0x14   :  { %s28_s27 = sshll.u32 %s273_s26, 4  ;;  %p221_p8 = scmp.ne.s32.totalorder %s351_s1, %s220_s30  ;;  %s29_s27 = int_to_ptr.vmem [resolvable:$true] %s28_s27 }
  0x15   :  { %p224_p9 = scmp.lt.u32.totalorder %s220_s30, %s351_s1 }
  0x17   :  { %p226_p10 = pnand %p224_p9, %p221_p8 }
  0x19   :  { %229 = shalt.err (!%p226_p10)
}
  0x1a   :  { %s230_s8 = scalar_lea.vmem %s29_s27, 256  ;;  %p235_p12 = scmp.lt.s32.totalorder %s29_s27, %s29_s27 }
  0x1b   :  { %p231_p11 = scmp.ne.s32.totalorder %s29_s27, %s230_s8  ;;  %p236_p13 = scmp.lt.s32.totalorder %s230_s8, %s230_s8 }
  0x1d   :  { %p237_p0 = por %p236_p13, %p235_p12 }
  0x1f   :  { %p238_p1 = pnand %p237_p0, %p231_p11 }
  0x21   :  { %241 = shalt.err (!%p238_p1)
}
  0x22   :  { %34 = dma.hbm_to_vmem [thread:$0]  %s351_s1, 256, %s29_s27, [#allocation7], %s271_s22, %s271_s22, %s272_s23  }
  0x23   :  { %264 = dma.done.wait [#allocation4], 128  }
  0x24   :  { %265 = vsyncadd [#allocation4], 4294967168 }
  0x25   :  { %266 = dma.done.wait [#allocation7], 256  }
  0x26   :  { %267 = vsyncadd [#allocation7], 4294967040  ;;  %vm48_vm0 = vcmask 261120   ;;  %v274_v0 = vmov 0.0   ;;  %vm275_vm1 = vmmov 0   ;;  %v195_v1 = vld [vmem:[#allocation6] sm:$0xff]  }
  0x27   :  { %180 = vmatprep.subr.bf16.mxu0 %v274_v0  ;;  %184 = vmatprep.mubr.msk.bf16.mxu0 %vm275_vm1, %v274_v0  ;;  %49 = vst.msk [vmem:[#allocation2] sm:$0xff] %vm48_vm0, %v274_v0  ;;  %50 = vst.msk [vmem:[#allocation2 + $0x8] sm:$0xff] %vm48_vm0, %v274_v0  ;;  %v196_v2 = vld [vmem:[#allocation6 + $0x8] sm:$0xff]   ;;  %v197_v3 = vld [vmem:[#allocation3] sm:$0xff]   ;;  %vm147_vm2 = vcmask 257024   ;;  %s276_s11 = smov [#allocation8]  }
  0x28   :  { %181 = vmatpush3.bf16.msra.mxu0 %v195_v1  ;;  %v172_v12 = vld [vmem:[%s352_s2] ss:$0 sm:$0xff]  ;;  %s155_s12 = sshll.u32 %s276_s11, 4  ;;  %s156_s12 = int_to_ptr.vmem [resolvable:$true] %s155_s12 }
  0x29   :  { %182 = vmatprep.subr.bf16.mxu0 %v274_v0  ;;  %s242_s13 = scalar_lea.vmem %s156_s12, 128  ;;  %p247_p3 = scmp.lt.s32.totalorder %s156_s12, %s156_s12 }
  0x2a   :  { %p243_p2 = scmp.ne.s32.totalorder %s156_s12, %s242_s13  ;;  %p248_p4 = scmp.lt.s32.totalorder %s242_s13, %s242_s13 }
  0x2c   :  { %183 = vmatpush3.bf16.msra.mxu0 %v196_v2  ;;  %p249_p5 = por %p248_p4, %p247_p3 }
  0x2e   :  { %v51_v4 = vld [vmem:[#allocation2] sm:$0xff]  ;;  %v52_v6 = vld [vmem:[#allocation2 + $0x8] sm:$0xff]  ;;  %p250_p6 = pnand %p249_p5, %p243_p2 }
  0x2f   :  { %185 = vmatmul.mubr.msk.bf16.vlgmr.msra.gmra.mrb[0].mxu0 %vm48_vm0, %v197_v3 }
 0x102   :  { %v114_v5 = vpop.f32.mrb[0].mxu0 }
 0x103   :  { %v121_v7 = vadd.f32 %v114_v5, %v51_v4  ;;  %v186_v8 = vpop.f32.mrb[1].mxu0 }
 0x104   :  { %v117_v9 = vpop.f32.mrb[2].mxu0 }
 0x105   :  { %123 = vst.msk [vmem:[#allocation2] sm:$0xff] %vm48_vm0, %v121_v7  ;;  %v122_v10 = vadd.f32 %v117_v9, %v52_v6  ;;  %v187_v11 = vpop.f32.mrb[3].mxu0 }
 0x107   :  { %124 = vst.msk [vmem:[#allocation2 + $0x8] sm:$0xff] %vm48_vm0, %v122_v10 }
 0x10c   :  { %v128_v13 = vld [vmem:[#allocation2] sm:$0xff] }
 0x10d   :  { %v137_v14 = vadd.f32 %v172_v12, %v128_v13 }
 0x10e   :  { %v129_v15 = vld [vmem:[#allocation2 + $0x8] sm:$0xff] }
 0x10f   :  { %v138_v16 = vadd.f32 %v172_v12, %v129_v15  ;;  %v175_v17 = vpack.c.bf16 %v137_v14, %v137_v14 }
 0x111   :  { %v176_v18 = vpack.c.bf16 %v138_v16, %v138_v16  ;;  %148 = vst.msk [vmem:[#allocation8] sm:$0xf] %vm147_vm2, %v175_v17 }
 0x113   :  { %149 = vst.msk [vmem:[#allocation8 + $0x4] sm:$0xf] %vm147_vm2, %v176_v18 }
 0x114   :  { %253 = shalt.err (!%p250_p6)
}
 0x115   :  { %s254_s15 = scalar_lea.hbm %s353_s3, 128 }
 0x116   :  { %p255_p7 = scmp.ne.s32.totalorder %s353_s3, %s254_s15  ;;  %p258_p8 = scmp.lt.u32.totalorder %s254_s15, %s353_s3 }
 0x118   :  { %p260_p9 = pnand %p258_p8, %p255_p7 }
 0x11a   :  { %263 = shalt.err (!%p260_p9)
}
 0x11b   :  { %161 = dma.vmem_to_hbm [thread:$0]  %s156_s12, 128, %s353_s3, [#allocation5], %s271_s22, %s271_s22, %s272_s23  }
 0x11c   :  { %268 = dma.done.wait [#allocation5], 128  }
 0x11d   :  { %269 = vsyncadd [#allocation5], 4294967168 }
 0x11e   :  { %165 = vsyncpa [#allocation4], 1 }
 0x11f   :  { %166 = vsyncpa [#allocation7], 1 }
 0x120   :  { %167 = vsyncpa [#allocation5], 1 }

</bundles_post_ra>
